<compile_context>
chip_gen: v7x
topology: tpu7x:2x2x1
jax: 0.10.0
libtpu: 0.0.40
codegen_flags: <defaults>
</compile_context>

<pallas_src>
import functools

import jax
import jax.numpy as jnp
from jax.experimental import pallas as pl
from jax.experimental.pallas import tpu as pltpu

_BN_EPS = 1e-5
_LANE = 128
_SUBLANE = 8
_NEG_BIG = -1e30          # additive mask value for padded softmax lanes


def _round_up(x, m):
    return ((x + m - 1) // m) * m


def _cdiv(a, b):
    return (a + b - 1) // b


def _apply_activation(y, activation):
    if activation == 'relu':
        return jnp.maximum(y, 0.0)
    if activation == 'sigmoid':
        return jax.nn.sigmoid(y)
    if activation == 'tanh':
        return jnp.tanh(y)
    if activation == 'leakyrelu':
        # The reference module explicitly uses nn.LeakyReLU(0.2).
        return jnp.where(y > 0, y, 0.2 * y)
    raise ValueError('Unknown activation type %s' % activation)


# ---------------------------------------------------------------------------
# Fused kernel: chained (folded-BN) linears + activations + final masked softmax.
# refs = (x, w_0, b_0, ..., w_{L-1}, b_{L-1}, softmax_mask, out, latent)
# ---------------------------------------------------------------------------
def _network_kernel(*refs, n_layers, n_enc, activation):
    x_ref = refs[0]
    wb = refs[1:1 + 2 * n_layers]
    mask_ref = refs[1 + 2 * n_layers]
    out_ref = refs[2 + 2 * n_layers]
    latent_ref = refs[3 + 2 * n_layers]

    h = x_ref[...]                                        # bf16, lane-padded
    for l in range(n_layers):
        w = wb[2 * l][...]                                # bf16
        b = wb[2 * l + 1][...]                            # f32
        y = jnp.dot(h, w, preferred_element_type=jnp.float32) + b   # f32 accum

        if l < n_layers - 1:
            a = _apply_activation(y, activation)          # f32 elementwise
            if l == n_enc - 1:
                latent_ref[...] = a.astype(latent_ref.dtype)
            h = a.astype(jnp.bfloat16)                    # bf16 for next MXU pass
        else:
            # Final layer: Softmax(dim=1) over valid lanes (precomputed additive mask).
            y = y + mask_ref[...]
            y = y - jnp.max(y, axis=1, keepdims=True)
            e = jnp.exp(y)
            inv = pl.reciprocal(jnp.sum(e, axis=1, keepdims=True), approx=False)
            out_ref[...] = (e * inv).astype(out_ref.dtype)


# ---------------------------------------------------------------------------
# Host-side (done ONCE): fold eval-mode BN into linears, pad, cast to bf16.
# ---------------------------------------------------------------------------
def _fold_bn(w, b, gamma, beta, mean, var):
    scale = gamma * jax.lax.rsqrt(var + _BN_EPS)          # (1, out)
    return w * scale, (b - mean) * scale + beta


def prepare_prediction(enc_params, dec_params, *, activation='relu', batchnorm=True):
    layers = []
    for p in enc_params:                                  # encoder: BN + act always
        w, b = p['w'], p['b']
        if batchnorm:
            w, b = _fold_bn(w, b, p['gamma'], p['beta'], p['mean'], p['var'])
        layers.append((w, b))
    n_dec = len(dec_params)
    for j, p in enumerate(dec_params):                    # decoder: BN+act except last
        w, b = p['w'], p['b']
        if batchnorm and j < n_dec - 1:
            w, b = _fold_bn(w, b, p['gamma'], p['beta'], p['mean'], p['var'])
        layers.append((w, b))

    n_layers = len(layers)
    n_enc = len(enc_params)
    in_dim = layers[0][0].shape[0]
    latent_dim = layers[n_enc - 1][0].shape[1]
    final_dim = layers[-1][0].shape[1]

    pad_in = [_round_up(w.shape[0], _LANE) for w, _ in layers]
    pad_out = [_round_up(w.shape[1], _LANE) for w, _ in layers]

    wb_arrays = []
    for idx, (w, b) in enumerate(layers):
        wp = jnp.pad(w.astype(jnp.float32),
                     ((0, pad_in[idx] - w.shape[0]), (0, pad_out[idx] - w.shape[1])))
        bp = jnp.pad(b.astype(jnp.float32),
                     ((0, 0), (0, pad_out[idx] - b.shape[1])))
        wb_arrays += [wp.astype(jnp.bfloat16), bp]        # bf16 weights, f32 biases

    out_pad = pad_out[-1]
    lanes = jnp.arange(out_pad)[None, :]
    softmax_mask = jnp.where(lanes < final_dim, 0.0, _NEG_BIG).astype(jnp.float32)

    return dict(
        wb=tuple(wb_arrays), mask=softmax_mask,
        n_layers=n_layers, n_enc=n_enc, activation=activation,
        in_dim=in_dim, latent_dim=latent_dim, final_dim=final_dim,
        pad_in0=pad_in[0], out_pad=out_pad, latent_pad=pad_out[n_enc - 1],
    )


# ---------------------------------------------------------------------------
# Generation-aware row-block policy.
# ---------------------------------------------------------------------------
def _row_block_policy(n, pad_in0, out_pad, latent_pad, max_pad, weight_bytes):
    try:
        vmem_phys = int(pltpu.get_tpu_info().vmem_capacity_bytes)
    except Exception:
        vmem_phys = 128 << 20

    budget = vmem_phys // 2
    # Per-row VMEM cost: double-buffered x (bf16) / out / latent (f32) + activation headroom.
    row_cost = 2 * pad_in0 * 2 + 2 * out_pad * 4 + 2 * latent_pad * 4 + 4 * max_pad * 4
    avail = max(budget - 2 * weight_bytes, row_cost * _SUBLANE)
    gen_cap = 2048 if vmem_phys >= (100 << 20) else 512   # 128 MiB v5e/v6e vs 64 MiB v7x
    cap = max(_SUBLANE, min(gen_cap, (avail // row_cost) // _SUBLANE * _SUBLANE))

    grid_n = max(1, _cdiv(n, cap))
    # Dual-TensorCore chips (small per-core VMEM): keep >=2 row blocks so the
    # "parallel" batch axis can be sharded across both cores.
    if vmem_phys < (100 << 20) and n >= 8 * _SUBLANE and grid_n == 1:
        grid_n = 2
    block_n = _round_up(_cdiv(n, grid_n), _SUBLANE)       # balanced blocks
    n_pad = grid_n * block_n

    est = 2 * weight_bytes + block_n * row_cost + 2 * out_pad * 4
    vmem_limit = int(max(32 << 20, min(int(0.9 * vmem_phys), est + (16 << 20))))
    return block_n, grid_n, n_pad, vmem_limit


# ---------------------------------------------------------------------------
# Forward: mirrors Prediction.forward, returns (output, latent).
# ---------------------------------------------------------------------------
def prediction_forward(x, prepared):
    n, feat_dim = x.shape
    assert feat_dim == prepared['in_dim']

    n_layers = prepared['n_layers']
    n_enc = prepared['n_enc']
    pad_in0 = prepared['pad_in0']
    out_pad = prepared['out_pad']
    latent_pad = prepared['latent_pad']
    wb = prepared['wb']
    mask = prepared['mask']

    weight_bytes = sum(int(a.size) * a.dtype.itemsize for a in wb)
    max_pad = max([pad_in0, out_pad, latent_pad] + [max(a.shape) for a in wb])
    block_n, grid_n, n_pad, vmem_limit = _row_block_policy(
        n, pad_in0, out_pad, latent_pad, max_pad, weight_bytes)

    x_p = jnp.pad(x.astype(jnp.bfloat16),
                  ((0, n_pad - n), (0, pad_in0 - feat_dim)))

    kern = functools.partial(_network_kernel, n_layers=n_layers, n_enc=n_enc,
                             activation=prepared['activation'])

    def build(single_buffer_weights):
        in_specs = [pl.BlockSpec((block_n, pad_in0), lambda i: (i, 0))]
        for a in wb:
            if single_buffer_weights:
                # Constant-index blocks never get re-DMA'd -> one VMEM copy suffices.
                in_specs.append(pl.BlockSpec(a.shape, lambda i: (0, 0),
                                             pipeline_mode=pl.Buffered(1)))
            else:
                in_specs.append(pl.BlockSpec(a.shape, lambda i: (0, 0)))
        in_specs.append(pl.BlockSpec(mask.shape, lambda i: (0, 0)))
        return pl.pallas_call(
            kern,
            out_shape=(jax.ShapeDtypeStruct((n_pad, out_pad), jnp.float32),
                       jax.ShapeDtypeStruct((n_pad, latent_pad), jnp.float32)),
            grid=(grid_n,),
            in_specs=in_specs,
            out_specs=(pl.BlockSpec((block_n, out_pad), lambda i: (i, 0)),
                       pl.BlockSpec((block_n, latent_pad), lambda i: (i, 0))),
            compiler_params=pltpu.CompilerParams(
                dimension_semantics=("parallel",),
                vmem_limit_bytes=vmem_limit),
        )

    flat_inputs = [x_p, *wb, mask]
    try:
        out_p, latent_p = build(True)(*flat_inputs)
    except Exception:
        # Fallback for jax versions without pipeline_mode=pl.Buffered support.
        out_p, latent_p = build(False)(*flat_inputs)

    return out_p[:n, :feat_dim], latent_p[:n, :prepared['latent_dim']]


# ---------------------------------------------------------------------------
# Parameter init (mimics nn.Linear / nn.BatchNorm1d defaults).
# ---------------------------------------------------------------------------
def _make_linear_params(key, fan_in, fan_out):
    k_w, k_b = jax.random.split(key)
    bound = 1.0 / float(fan_in) ** 0.5
    w = jax.random.uniform(k_w, (fan_in, fan_out), minval=-bound, maxval=bound,
                           dtype=jnp.float32)
    b = jax.random.uniform(k_b, (1, fan_out), minval=-bound, maxval=bound,
                           dtype=jnp.float32)
    gamma = jnp.ones((1, fan_out), jnp.float32)
    beta = jnp.zeros((1, fan_out), jnp.float32)
    mean = jnp.zeros((1, fan_out), jnp.float32)
    var = jnp.ones((1, fan_out), jnp.float32)
    return dict(w=w, b=b, gamma=gamma, beta=beta, mean=mean, var=var)


def init_prediction_params(key, prediction_dim):
    depth = len(prediction_dim) - 1
    enc_params, dec_params = [], []
    for i in range(depth):
        key, sub = jax.random.split(key)
        enc_params.append(
            _make_linear_params(sub, prediction_dim[i], prediction_dim[i + 1]))
    for i in range(depth, 0, -1):
        key, sub = jax.random.split(key)
        dec_params.append(
            _make_linear_params(sub, prediction_dim[i], prediction_dim[i - 1]))
    return enc_params, dec_params


# ---------------------------------------------------------------------------
# Pure-JAX reference (eval-mode BN, f32) for a correctness cross-check.
# ---------------------------------------------------------------------------
def _reference_forward(x, enc_params, dec_params, *, activation, batchnorm):
    def bn(y, p):
        return ((y - p['mean']) * jax.lax.rsqrt(p['var'] + _BN_EPS)
                * p['gamma'] + p['beta'])

    h = x
    for p in enc_params:
        h = h @ p['w'] + p['b']
        if batchnorm:
            h = bn(h, p)
        h = _apply_activation(h, activation)
    latent = h
    n_dec = len(dec_params)
    for j, p in enumerate(dec_params):
        h = h @ p['w'] + p['b']
        if j < n_dec - 1:
            if batchnorm:
                h = bn(h, p)
            h = _apply_activation(h, activation)
    out = jax.nn.softmax(h, axis=1)
    return out, latent


if __name__ == "__main__":
    prediction_dim = [16, 32, 8]   # feat_dim=16, hidden=32, latent_dim=8
    num = 8                        # batch of samples

    key = jax.random.PRNGKey(0)
    key_params, key_x = jax.random.split(key)
    enc_params, dec_params = init_prediction_params(key_params, prediction_dim)

    x = jax.random.normal(key_x, (num, prediction_dim[0]), dtype=jnp.float32)

    # BN folding / padding / bf16 cast happens once here, not per forward call.
    prepared = prepare_prediction(enc_params, dec_params,
                                  activation='relu', batchnorm=True)

    output, latent = prediction_forward(x, prepared)
    output = jax.block_until_ready(output)
    latent = jax.block_until_ready(latent)

    assert output.shape == (num, prediction_dim[0])
    assert latent.shape == (num, prediction_dim[-1])
    # Exact reciprocal -> softmax rows sum to 1 within f32 rounding.
    assert jnp.allclose(jnp.sum(output, axis=1), 1.0, atol=1e-4)

    # Cross-check against the f32 eval-mode reference (bf16 matmul tolerance).
    ref_out, ref_lat = _reference_forward(x, enc_params, dec_params,
                                          activation='relu', batchnorm=True)
    assert jnp.allclose(latent, ref_lat, atol=5e-2, rtol=5e-2)
    assert jnp.allclose(output, ref_out, atol=2e-2, rtol=5e-2)

    print("KERNEL_OK")
</pallas_src>

<mosaic_0001>
module attributes {stable_mosaic.version = 11 : i64} {
  func.func @_network_kernel(%arg0: i32, %arg1: memref<8x128xbf16, #tpu.memory_space<vmem>>, %arg2: memref<128x128xbf16, #tpu.memory_space<vmem>>, %arg3: memref<1x128xf32, #tpu.memory_space<vmem>>, %arg4: memref<128x128xbf16, #tpu.memory_space<vmem>>, %arg5: memref<1x128xf32, #tpu.memory_space<vmem>>, %arg6: memref<128x128xbf16, #tpu.memory_space<vmem>>, %arg7: memref<1x128xf32, #tpu.memory_space<vmem>>, %arg8: memref<128x128xbf16, #tpu.memory_space<vmem>>, %arg9: memref<1x128xf32, #tpu.memory_space<vmem>>, %arg10: memref<1x128xf32, #tpu.memory_space<vmem>>, %arg11: memref<8x128xf32, #tpu.memory_space<vmem>>, %arg12: memref<8x128xf32, #tpu.memory_space<vmem>>) attributes {dimension_semantics = [#tpu.dimension_semantics<parallel>], iteration_bounds = array<i64: 1>, scalar_prefetch = 0 : i64, scratch_operands = 0 : i64, tpu.core_type = #tpu.core_type<tc>, window_params = [{transform_indices = @transform_0, window_bounds = array<i64: 8, 128>}, {pipeline_mode = #tpu.pipeline_mode<synchronous>, transform_indices = @transform_1, window_bounds = array<i64: 128, 128>}, {pipeline_mode = #tpu.pipeline_mode<synchronous>, transform_indices = @transform_2, window_bounds = array<i64: 1, 128>}, {pipeline_mode = #tpu.pipeline_mode<synchronous>, transform_indices = @transform_3, window_bounds = array<i64: 128, 128>}, {pipeline_mode = #tpu.pipeline_mode<synchronous>, transform_indices = @transform_4, window_bounds = array<i64: 1, 128>}, {pipeline_mode = #tpu.pipeline_mode<synchronous>, transform_indices = @transform_5, window_bounds = array<i64: 128, 128>}, {pipeline_mode = #tpu.pipeline_mode<synchronous>, transform_indices = @transform_6, window_bounds = array<i64: 1, 128>}, {pipeline_mode = #tpu.pipeline_mode<synchronous>, transform_indices = @transform_7, window_bounds = array<i64: 128, 128>}, {pipeline_mode = #tpu.pipeline_mode<synchronous>, transform_indices = @transform_8, window_bounds = array<i64: 1, 128>}, {pipeline_mode = #tpu.pipeline_mode<synchronous>, transform_indices = @transform_9, window_bounds = array<i64: 1, 128>}, {transform_indices = @transform_10, window_bounds = array<i64: 8, 128>}, {transform_indices = @transform_11, window_bounds = array<i64: 8, 128>}]} {
    %c0 = arith.constant 0 : index
    %c0_0 = arith.constant 0 : index
    %0 = vector.load %arg1[%c0, %c0_0] : memref<8x128xbf16, #tpu.memory_space<vmem>>, vector<8x128xbf16>
    %c0_1 = arith.constant 0 : index
    %c0_2 = arith.constant 0 : index
    %1 = vector.load %arg2[%c0_1, %c0_2] : memref<128x128xbf16, #tpu.memory_space<vmem>>, vector<128x128xbf16>
    %c0_3 = arith.constant 0 : index
    %c0_4 = arith.constant 0 : index
    %2 = vector.load %arg3[%c0_3, %c0_4] : memref<1x128xf32, #tpu.memory_space<vmem>>, vector<1x128xf32>
    %cst = arith.constant dense<0.000000e+00> : vector<8x128xf32>
    %3 = tpu.matmul %0, %1, %cst {dimension_numbers = #tpu.dot_dimension_numbers<[1], [0], [0], [1], [0, 0, 1, 1], [], []>} : vector<8x128xbf16>, vector<128x128xbf16>, vector<8x128xf32> -> vector<8x128xf32>
    %4 = vector.broadcast %2 : vector<1x128xf32> to vector<8x128xf32>
    %5 = arith.addf %3, %4 : vector<8x128xf32>
    %cst_5 = arith.constant 0.000000e+00 : f32
    %6 = vector.broadcast %cst_5 : f32 to vector<8x128xf32>
    %7 = arith.maximumf %5, %6 : vector<8x128xf32>
    %8 = arith.truncf %7 : vector<8x128xf32> to vector<8x128xbf16>
    %c0_6 = arith.constant 0 : index
    %c0_7 = arith.constant 0 : index
    %9 = vector.load %arg4[%c0_6, %c0_7] : memref<128x128xbf16, #tpu.memory_space<vmem>>, vector<128x128xbf16>
    %c0_8 = arith.constant 0 : index
    %c0_9 = arith.constant 0 : index
    %10 = vector.load %arg5[%c0_8, %c0_9] : memref<1x128xf32, #tpu.memory_space<vmem>>, vector<1x128xf32>
    %cst_10 = arith.constant dense<0.000000e+00> : vector<8x128xf32>
    %11 = tpu.matmul %8, %9, %cst_10 {dimension_numbers = #tpu.dot_dimension_numbers<[1], [0], [0], [1], [0, 0, 1, 1], [], []>} : vector<8x128xbf16>, vector<128x128xbf16>, vector<8x128xf32> -> vector<8x128xf32>
    %12 = vector.broadcast %10 : vector<1x128xf32> to vector<8x128xf32>
    %13 = arith.addf %11, %12 : vector<8x128xf32>
    %cst_11 = arith.constant 0.000000e+00 : f32
    %14 = vector.broadcast %cst_11 : f32 to vector<8x128xf32>
    %15 = arith.maximumf %13, %14 : vector<8x128xf32>
    %c0_12 = arith.constant 0 : index
    %c0_13 = arith.constant 0 : index
    %16 = vector.load %arg12[%c0_12, %c0_13] : memref<8x128xf32, #tpu.memory_space<vmem>>, vector<8x128xf32>
    tpu.vector_store %arg12[%c0_12, %c0_13], %15 {strides = array<i32>} : memref<8x128xf32, #tpu.memory_space<vmem>>, vector<8x128xf32>,
    %17 = arith.truncf %15 : vector<8x128xf32> to vector<8x128xbf16>
    %c0_14 = arith.constant 0 : index
    %c0_15 = arith.constant 0 : index
    %18 = vector.load %arg6[%c0_14, %c0_15] : memref<128x128xbf16, #tpu.memory_space<vmem>>, vector<128x128xbf16>
    %c0_16 = arith.constant 0 : index
    %c0_17 = arith.constant 0 : index
    %19 = vector.load %arg7[%c0_16, %c0_17] : memref<1x128xf32, #tpu.memory_space<vmem>>, vector<1x128xf32>
    %cst_18 = arith.constant dense<0.000000e+00> : vector<8x128xf32>
    %20 = tpu.matmul %17, %18, %cst_18 {dimension_numbers = #tpu.dot_dimension_numbers<[1], [0], [0], [1], [0, 0, 1, 1], [], []>} : vector<8x128xbf16>, vector<128x128xbf16>, vector<8x128xf32> -> vector<8x128xf32>
    %21 = vector.broadcast %19 : vector<1x128xf32> to vector<8x128xf32>
    %22 = arith.addf %20, %21 : vector<8x128xf32>
    %cst_19 = arith.constant 0.000000e+00 : f32
    %23 = vector.broadcast %cst_19 : f32 to vector<8x128xf32>
    %24 = arith.maximumf %22, %23 : vector<8x128xf32>
    %25 = arith.truncf %24 : vector<8x128xf32> to vector<8x128xbf16>
    %c0_20 = arith.constant 0 : index
    %c0_21 = arith.constant 0 : index
    %26 = vector.load %arg8[%c0_20, %c0_21] : memref<128x128xbf16, #tpu.memory_space<vmem>>, vector<128x128xbf16>
    %c0_22 = arith.constant 0 : index
    %c0_23 = arith.constant 0 : index
    %27 = vector.load %arg9[%c0_22, %c0_23] : memref<1x128xf32, #tpu.memory_space<vmem>>, vector<1x128xf32>
    %cst_24 = arith.constant dense<0.000000e+00> : vector<8x128xf32>
    %28 = tpu.matmul %25, %26, %cst_24 {dimension_numbers = #tpu.dot_dimension_numbers<[1], [0], [0], [1], [0, 0, 1, 1], [], []>} : vector<8x128xbf16>, vector<128x128xbf16>, vector<8x128xf32> -> vector<8x128xf32>
    %29 = vector.broadcast %27 : vector<1x128xf32> to vector<8x128xf32>
    %30 = arith.addf %28, %29 : vector<8x128xf32>
    %c0_25 = arith.constant 0 : index
    %c0_26 = arith.constant 0 : index
    %31 = vector.load %arg10[%c0_25, %c0_26] : memref<1x128xf32, #tpu.memory_space<vmem>>, vector<1x128xf32>
    %32 = vector.broadcast %31 : vector<1x128xf32> to vector<8x128xf32>
    %33 = arith.addf %30, %32 : vector<8x128xf32>
    %cst_27 = arith.constant dense<0xFF800000> : vector<8xf32>
    %34 = vector.multi_reduction <maximumf>, %33, %cst_27 [1] : vector<8x128xf32> to vector<8xf32>
    %35 = vector.shape_cast %34 : vector<8xf32> to vector<8x1xf32>
    %36 = vector.broadcast %35 : vector<8x1xf32> to vector<8x128xf32>
    %37 = arith.subf %33, %36 : vector<8x128xf32>
    %38 = math.exp %37 : vector<8x128xf32>
    %cst_28 = arith.constant dense<0.000000e+00> : vector<8xf32>
    %39 = vector.multi_reduction <add>, %38, %cst_28 [1] : vector<8x128xf32> to vector<8xf32>
    %40 = vector.shape_cast %39 : vector<8xf32> to vector<8x1xf32>
    %41 = tpu.reciprocal %40 : vector<8x1xf32> -> vector<8x1xf32>
    %42 = vector.broadcast %41 : vector<8x1xf32> to vector<8x128xf32>
    %43 = arith.mulf %38, %42 : vector<8x128xf32>
    %c0_29 = arith.constant 0 : index
    %c0_30 = arith.constant 0 : index
    %44 = vector.load %arg11[%c0_29, %c0_30] : memref<8x128xf32, #tpu.memory_space<vmem>>, vector<8x128xf32>
    tpu.vector_store %arg11[%c0_29, %c0_30], %43 {strides = array<i32>} : memref<8x128xf32, #tpu.memory_space<vmem>>, vector<8x128xf32>,
    return
  }
  func.func @transform_0(%arg0: i32) -> (i32, i32) {
    %c0_i32 = arith.constant 0 : i32
    %c0_i32_0 = arith.constant 0 : i32
    return %arg0, %c0_i32 : i32, i32
  }
  func.func @transform_1(%arg0: i32) -> (i32, i32) {
    %c0_i32 = arith.constant 0 : i32
    %c0_i32_0 = arith.constant 0 : i32
    %c0_i32_1 = arith.constant 0 : i32
    return %c0_i32, %c0_i32_0 : i32, i32
  }
  func.func @transform_2(%arg0: i32) -> (i32, i32) {
    %c0_i32 = arith.constant 0 : i32
    %c0_i32_0 = arith.constant 0 : i32
    %c0_i32_1 = arith.constant 0 : i32
    return %c0_i32, %c0_i32_0 : i32, i32
  }
  func.func @transform_3(%arg0: i32) -> (i32, i32) {
    %c0_i32 = arith.constant 0 : i32
    %c0_i32_0 = arith.constant 0 : i32
    %c0_i32_1 = arith.constant 0 : i32
    return %c0_i32, %c0_i32_0 : i32, i32
  }
  func.func @transform_4(%arg0: i32) -> (i32, i32) {
    %c0_i32 = arith.constant 0 : i32
    %c0_i32_0 = arith.constant 0 : i32
    %c0_i32_1 = arith.constant 0 : i32
    return %c0_i32, %c0_i32_0 : i32, i32
  }
  func.func @transform_5(%arg0: i32) -> (i32, i32) {
    %c0_i32 = arith.constant 0 : i32
    %c0_i32_0 = arith.constant 0 : i32
    %c0_i32_1 = arith.constant 0 : i32
    return %c0_i32, %c0_i32_0 : i32, i32
  }
  func.func @transform_6(%arg0: i32) -> (i32, i32) {
    %c0_i32 = arith.constant 0 : i32
    %c0_i32_0 = arith.constant 0 : i32
    %c0_i32_1 = arith.constant 0 : i32
    return %c0_i32, %c0_i32_0 : i32, i32
  }
  func.func @transform_7(%arg0: i32) -> (i32, i32) {
    %c0_i32 = arith.constant 0 : i32
    %c0_i32_0 = arith.constant 0 : i32
    %c0_i32_1 = arith.constant 0 : i32
    return %c0_i32, %c0_i32_0 : i32, i32
  }
  func.func @transform_8(%arg0: i32) -> (i32, i32) {
    %c0_i32 = arith.constant 0 : i32
    %c0_i32_0 = arith.constant 0 : i32
    %c0_i32_1 = arith.constant 0 : i32
    return %c0_i32, %c0_i32_0 : i32, i32
  }
  func.func @transform_9(%arg0: i32) -> (i32, i32) {
    %c0_i32 = arith.constant 0 : i32
    %c0_i32_0 = arith.constant 0 : i32
    %c0_i32_1 = arith.constant 0 : i32
    return %c0_i32, %c0_i32_0 : i32, i32
  }
  func.func @transform_10(%arg0: i32) -> (i32, i32) {
    %c0_i32 = arith.constant 0 : i32
    %c0_i32_0 = arith.constant 0 : i32
    return %arg0, %c0_i32 : i32, i32
  }
  func.func @transform_11(%arg0: i32) -> (i32, i32) {
    %c0_i32 = arith.constant 0 : i32
    %c0_i32_0 = arith.constant 0 : i32
    return %arg0, %c0_i32 : i32, i32
  }
}

module attributes {stable_mosaic.version = 11 : i64} {
  func.func @_network_kernel(%arg0: i32, %arg1: memref<8x128xbf16, #tpu.memory_space<vmem>>, %arg2: memref<128x128xbf16, #tpu.memory_space<vmem>>, %arg3: memref<1x128xf32, #tpu.memory_space<vmem>>, %arg4: memref<128x128xbf16, #tpu.memory_space<vmem>>, %arg5: memref<1x128xf32, #tpu.memory_space<vmem>>, %arg6: memref<128x128xbf16, #tpu.memory_space<vmem>>, %arg7: memref<1x128xf32, #tpu.memory_space<vmem>>, %arg8: memref<128x128xbf16, #tpu.memory_space<vmem>>, %arg9: memref<1x128xf32, #tpu.memory_space<vmem>>, %arg10: memref<1x128xf32, #tpu.memory_space<vmem>>, %arg11: memref<8x128xf32, #tpu.memory_space<vmem>>, %arg12: memref<8x128xf32, #tpu.memory_space<vmem>>) attributes {dimension_semantics = [#tpu.dimension_semantics<parallel>], iteration_bounds = array<i64: 1>, scalar_prefetch = 0 : i64, scratch_operands = 0 : i64, tpu.core_type = #tpu.core_type<tc>, window_params = [{transform_indices = @transform_0, window_bounds = array<i64: 8, 128>}, {pipeline_mode = #tpu.pipeline_mode<synchronous>, transform_indices = @transform_1, window_bounds = array<i64: 128, 128>}, {pipeline_mode = #tpu.pipeline_mode<synchronous>, transform_indices = @transform_2, window_bounds = array<i64: 1, 128>}, {pipeline_mode = #tpu.pipeline_mode<synchronous>, transform_indices = @transform_3, window_bounds = array<i64: 128, 128>}, {pipeline_mode = #tpu.pipeline_mode<synchronous>, transform_indices = @transform_4, window_bounds = array<i64: 1, 128>}, {pipeline_mode = #tpu.pipeline_mode<synchronous>, transform_indices = @transform_5, window_bounds = array<i64: 128, 128>}, {pipeline_mode = #tpu.pipeline_mode<synchronous>, transform_indices = @transform_6, window_bounds = array<i64: 1, 128>}, {pipeline_mode = #tpu.pipeline_mode<synchronous>, transform_indices = @transform_7, window_bounds = array<i64: 128, 128>}, {pipeline_mode = #tpu.pipeline_mode<synchronous>, transform_indices = @transform_8, window_bounds = array<i64: 1, 128>}, {pipeline_mode = #tpu.pipeline_mode<synchronous>, transform_indices = @transform_9, window_bounds = array<i64: 1, 128>}, {transform_indices = @transform_10, window_bounds = array<i64: 8, 128>}, {transform_indices = @transform_11, window_bounds = array<i64: 8, 128>}]} {
    %c0 = arith.constant 0 : index
    %c0_0 = arith.constant 0 : index
    %0 = vector.load %arg1[%c0, %c0_0] : memref<8x128xbf16, #tpu.memory_space<vmem>>, vector<8x128xbf16>
    %c0_1 = arith.constant 0 : index
    %c0_2 = arith.constant 0 : index
    %1 = vector.load %arg2[%c0_1, %c0_2] : memref<128x128xbf16, #tpu.memory_space<vmem>>, vector<128x128xbf16>
    %c0_3 = arith.constant 0 : index
    %c0_4 = arith.constant 0 : index
    %2 = vector.load %arg3[%c0_3, %c0_4] : memref<1x128xf32, #tpu.memory_space<vmem>>, vector<1x128xf32>
    %cst = arith.constant dense<0.000000e+00> : vector<8x128xf32>
    %3 = tpu.matmul %0, %1, %cst {dimension_numbers = #tpu.dot_dimension_numbers<[1], [0], [0], [1], [0, 0, 1, 1], [], []>} : vector<8x128xbf16>, vector<128x128xbf16>, vector<8x128xf32> -> vector<8x128xf32>
    %4 = vector.broadcast %2 : vector<1x128xf32> to vector<8x128xf32>
    %5 = arith.addf %3, %4 : vector<8x128xf32>
    %cst_5 = arith.constant 0.000000e+00 : f32
    %6 = vector.broadcast %cst_5 : f32 to vector<8x128xf32>
    %7 = arith.maximumf %5, %6 : vector<8x128xf32>
    %8 = arith.truncf %7 : vector<8x128xf32> to vector<8x128xbf16>
    %c0_6 = arith.constant 0 : index
    %c0_7 = arith.constant 0 : index
    %9 = vector.load %arg4[%c0_6, %c0_7] : memref<128x128xbf16, #tpu.memory_space<vmem>>, vector<128x128xbf16>
    %c0_8 = arith.constant 0 : index
    %c0_9 = arith.constant 0 : index
    %10 = vector.load %arg5[%c0_8, %c0_9] : memref<1x128xf32, #tpu.memory_space<vmem>>, vector<1x128xf32>
    %cst_10 = arith.constant dense<0.000000e+00> : vector<8x128xf32>
    %11 = tpu.matmul %8, %9, %cst_10 {dimension_numbers = #tpu.dot_dimension_numbers<[1], [0], [0], [1], [0, 0, 1, 1], [], []>} : vector<8x128xbf16>, vector<128x128xbf16>, vector<8x128xf32> -> vector<8x128xf32>
    %12 = vector.broadcast %10 : vector<1x128xf32> to vector<8x128xf32>
    %13 = arith.addf %11, %12 : vector<8x128xf32>
    %cst_11 = arith.constant 0.000000e+00 : f32
    %14 = vector.broadcast %cst_11 : f32 to vector<8x128xf32>
    %15 = arith.maximumf %13, %14 : vector<8x128xf32>
    %c0_12 = arith.constant 0 : index
    %c0_13 = arith.constant 0 : index
    %16 = vector.load %arg12[%c0_12, %c0_13] : memref<8x128xf32, #tpu.memory_space<vmem>>, vector<8x128xf32>
    tpu.vector_store %arg12[%c0_12, %c0_13], %15 {strides = array<i32>} : memref<8x128xf32, #tpu.memory_space<vmem>>, vector<8x128xf32>,
    %17 = arith.truncf %15 : vector<8x128xf32> to vector<8x128xbf16>
    %c0_14 = arith.constant 0 : index
    %c0_15 = arith.constant 0 : index
    %18 = vector.load %arg6[%c0_14, %c0_15] : memref<128x128xbf16, #tpu.memory_space<vmem>>, vector<128x128xbf16>
    %c0_16 = arith.constant 0 : index
    %c0_17 = arith.constant 0 : index
    %19 = vector.load %arg7[%c0_16, %c0_17] : memref<1x128xf32, #tpu.memory_space<vmem>>, vector<1x128xf32>
    %cst_18 = arith.constant dense<0.000000e+00> : vector<8x128xf32>
    %20 = tpu.matmul %17, %18, %cst_18 {dimension_numbers = #tpu.dot_dimension_numbers<[1], [0], [0], [1], [0, 0, 1, 1], [], []>} : vector<8x128xbf16>, vector<128x128xbf16>, vector<8x128xf32> -> vector<8x128xf32>
    %21 = vector.broadcast %19 : vector<1x128xf32> to vector<8x128xf32>
    %22 = arith.addf %20, %21 : vector<8x128xf32>
    %cst_19 = arith.constant 0.000000e+00 : f32
    %23 = vector.broadcast %cst_19 : f32 to vector<8x128xf32>
    %24 = arith.maximumf %22, %23 : vector<8x128xf32>
    %25 = arith.truncf %24 : vector<8x128xf32> to vector<8x128xbf16>
    %c0_20 = arith.constant 0 : index
    %c0_21 = arith.constant 0 : index
    %26 = vector.load %arg8[%c0_20, %c0_21] : memref<128x128xbf16, #tpu.memory_space<vmem>>, vector<128x128xbf16>
    %c0_22 = arith.constant 0 : index
    %c0_23 = arith.constant 0 : index
    %27 = vector.load %arg9[%c0_22, %c0_23] : memref<1x128xf32, #tpu.memory_space<vmem>>, vector<1x128xf32>
    %cst_24 = arith.constant dense<0.000000e+00> : vector<8x128xf32>
    %28 = tpu.matmul %25, %26, %cst_24 {dimension_numbers = #tpu.dot_dimension_numbers<[1], [0], [0], [1], [0, 0, 1, 1], [], []>} : vector<8x128xbf16>, vector<128x128xbf16>, vector<8x128xf32> -> vector<8x128xf32>
    %29 = vector.broadcast %27 : vector<1x128xf32> to vector<8x128xf32>
    %30 = arith.addf %28, %29 : vector<8x128xf32>
    %c0_25 = arith.constant 0 : index
    %c0_26 = arith.constant 0 : index
    %31 = vector.load %arg10[%c0_25, %c0_26] : memref<1x128xf32, #tpu.memory_space<vmem>>, vector<1x128xf32>
    %32 = vector.broadcast %31 : vector<1x128xf32> to vector<8x128xf32>
    %33 = arith.addf %30, %32 : vector<8x128xf32>
    %cst_27 = arith.constant dense<0xFF800000> : vector<8xf32>
    %34 = vector.multi_reduction <maximumf>, %33, %cst_27 [1] : vector<8x128xf32> to vector<8xf32>
    %35 = vector.shape_cast %34 : vector<8xf32> to vector<8x1xf32>
    %36 = vector.broadcast %35 : vector<8x1xf32> to vector<8x128xf32>
    %37 = arith.subf %33, %36 : vector<8x128xf32>
    %38 = math.exp %37 : vector<8x128xf32>
    %cst_28 = arith.constant dense<0.000000e+00> : vector<8xf32>
    %39 = vector.multi_reduction <add>, %38, %cst_28 [1] : vector<8x128xf32> to vector<8xf32>
    %40 = vector.shape_cast %39 : vector<8xf32> to vector<8x1xf32>
    %41 = tpu.reciprocal %40 : vector<8x1xf32> -> vector<8x1xf32>
    %42 = vector.broadcast %41 : vector<8x1xf32> to vector<8x128xf32>
    %43 = arith.mulf %38, %42 : vector<8x128xf32>
    %c0_29 = arith.constant 0 : index
    %c0_30 = arith.constant 0 : index
    %44 = vector.load %arg11[%c0_29, %c0_30] : memref<8x128xf32, #tpu.memory_space<vmem>>, vector<8x128xf32>
    tpu.vector_store %arg11[%c0_29, %c0_30], %43 {strides = array<i32>} : memref<8x128xf32, #tpu.memory_space<vmem>>, vector<8x128xf32>,
    return
  }
  func.func @transform_0(%arg0: i32) -> (i32, i32) {
    %c0_i32 = arith.constant 0 : i32
    %c0_i32_0 = arith.constant 0 : i32
    return %arg0, %c0_i32 : i32, i32
  }
  func.func @transform_1(%arg0: i32) -> (i32, i32) {
    %c0_i32 = arith.constant 0 : i32
    %c0_i32_0 = arith.constant 0 : i32
    %c0_i32_1 = arith.constant 0 : i32
    return %c0_i32, %c0_i32_0 : i32, i32
  }
  func.func @transform_2(%arg0: i32) -> (i32, i32) {
    %c0_i32 = arith.constant 0 : i32
    %c0_i32_0 = arith.constant 0 : i32
    %c0_i32_1 = arith.constant 0 : i32
    return %c0_i32, %c0_i32_0 : i32, i32
  }
  func.func @transform_3(%arg0: i32) -> (i32, i32) {
    %c0_i32 = arith.constant 0 : i32
    %c0_i32_0 = arith.constant 0 : i32
    %c0_i32_1 = arith.constant 0 : i32
    return %c0_i32, %c0_i32_0 : i32, i32
  }
  func.func @transform_4(%arg0: i32) -> (i32, i32) {
    %c0_i32 = arith.constant 0 : i32
    %c0_i32_0 = arith.constant 0 : i32
    %c0_i32_1 = arith.constant 0 : i32
    return %c0_i32, %c0_i32_0 : i32, i32
  }
  func.func @transform_5(%arg0: i32) -> (i32, i32) {
    %c0_i32 = arith.constant 0 : i32
    %c0_i32_0 = arith.constant 0 : i32
    %c0_i32_1 = arith.constant 0 : i32
    return %c0_i32, %c0_i32_0 : i32, i32
  }
  func.func @transform_6(%arg0: i32) -> (i32, i32) {
    %c0_i32 = arith.constant 0 : i32
    %c0_i32_0 = arith.constant 0 : i32
    %c0_i32_1 = arith.constant 0 : i32
    return %c0_i32, %c0_i32_0 : i32, i32
  }
  func.func @transform_7(%arg0: i32) -> (i32, i32) {
    %c0_i32 = arith.constant 0 : i32
    %c0_i32_0 = arith.constant 0 : i32
    %c0_i32_1 = arith.constant 0 : i32
    return %c0_i32, %c0_i32_0 : i32, i32
  }
  func.func @transform_8(%arg0: i32) -> (i32, i32) {
    %c0_i32 = arith.constant 0 : i32
    %c0_i32_0 = arith.constant 0 : i32
    %c0_i32_1 = arith.constant 0 : i32
    return %c0_i32, %c0_i32_0 : i32, i32
  }
  func.func @transform_9(%arg0: i32) -> (i32, i32) {
    %c0_i32 = arith.constant 0 : i32
    %c0_i32_0 = arith.constant 0 : i32
    %c0_i32_1 = arith.constant 0 : i32
    return %c0_i32, %c0_i32_0 : i32, i32
  }
  func.func @transform_10(%arg0: i32) -> (i32, i32) {
    %c0_i32 = arith.constant 0 : i32
    %c0_i32_0 = arith.constant 0 : i32
    return %arg0, %c0_i32 : i32, i32
  }
  func.func @transform_11(%arg0: i32) -> (i32, i32) {
    %c0_i32 = arith.constant 0 : i32
    %c0_i32_0 = arith.constant 0 : i32
    return %arg0, %c0_i32 : i32, i32
  }
}

</mosaic_0001>

<bundles_post_ra>
// kernel: tpu_custom_call.1
= control target key start
LH: loop header
LB: loop body
LE: loop exit
PB: predicated region body
PF: predicated region fallthrough
CT: control target
= control target key end

     0   :  { %17 = vsyncpa [#allocation3], 0  ;;  %s1193_s0 = inlined_call_operand.hbm [shape: bf16[8,128], index: 0, kind: input, shape index: {}]   ;;  %s1194_s1 = inlined_call_operand.hbm [shape: bf16[128,128], index: 1, kind: input, shape index: {}]   ;;  %s1195_s2 = inlined_call_operand.vmem [shape: f32[1,128], index: 2, kind: input, shape index: {}]   ;;  %s1196_s3 = inlined_call_operand.hbm [shape: bf16[128,128], index: 3, kind: input, shape index: {}]   ;;  %s1197_s4 = inlined_call_operand.vmem [shape: f32[1,128], index: 4, kind: input, shape index: {}]   ;;  %s1198_s5 = inlined_call_operand.hbm [shape: bf16[128,128], index: 5, kind: input, shape index: {}]   ;;  %s1199_s6 = inlined_call_operand.vmem [shape: f32[1,128], index: 6, kind: input, shape index: {}]   ;;  %s1200_s7 = inlined_call_operand.hbm [shape: bf16[128,128], index: 7, kind: input, shape index: {}]   ;;  %s1201_s8 = inlined_call_operand.vmem [shape: f32[1,128], index: 8, kind: input, shape index: {}]   ;;  %s1202_s9 = inlined_call_operand.vmem [shape: f32[1,128], index: 9, kind: input, shape index: {}]   ;;  %s1203_s10 = inlined_call_operand.hbm [shape: f32[8,128], index: 10, kind: output, shape index: {0}]   ;;  %s1204_s11 = inlined_call_operand.hbm [shape: f32[8,128], index: 11, kind: output, shape index: {1}]  }
   0x1   :  { %18 = vsyncpa [#allocation6], 0 }
   0x2   :  { %19 = vsyncpa [#allocation9], 0 }
   0x3   :  { %20 = vsyncpa [#allocation4], 0 }
   0x4   :  { %21 = vsyncpa [#allocation13], 0  ;;  %s971_s17 = smov [#allocation5]   ;;  %s807_s21 = scalar_lea.hbm %s1194_s1, 1024 }
   0x5   :  { %s37_s18 = sshll.u32 %s971_s17, 4  ;;  %p808_p0 = scmp.ne.s32.totalorder %s1194_s1, %s807_s21  ;;  %s38_s18 = int_to_ptr.vmem [resolvable:$true] %s37_s18 }
   0x6   :  { %p811_p1 = scmp.lt.u32.totalorder %s807_s21, %s1194_s1 }
   0x8   :  { %p813_p2 = pnand %p811_p1, %p808_p0 }
   0xa   :  { %816 = shalt.err (!%p813_p2)
}
   0xb   :  { %s817_s26 = scalar_lea.vmem %s38_s18, 1024  ;;  %p822_p4 = scmp.lt.s32.totalorder %s38_s18, %s38_s18 }
   0xc   :  { %p818_p3 = scmp.ne.s32.totalorder %s38_s18, %s817_s26  ;;  %p823_p5 = scmp.lt.s32.totalorder %s817_s26, %s817_s26 }
   0xe   :  { %p824_p6 = por %p823_p5, %p822_p4 }
  0x10   :  { %p825_p7 = pnand %p824_p6, %p818_p3 }
  0x12   :  { %828 = shalt.err (!%p825_p7)
}
  0x13   :  { %s972_s27 = smov 64   ;;  %s973_s28 = smov 4  }
  0x14   :  { %43 = dma.hbm_to_vmem [thread:$0]  %s1194_s1, 1024, %s38_s18, [#allocation6], %s972_s27, %s972_s27, %s973_s28  }
  0x15   :  { %s974_s12 = smov [#allocation8]   ;;  %s975_s14 = smov [#allocation2]  }
  0x16   :  { %s65_s13 = sshll.u32 %s974_s12, 4  ;;  %s28_s15 = sshll.u32 %s975_s14, 4  ;;  %s66_s13 = int_to_ptr.vmem [resolvable:$true] %s65_s13  ;;  %s29_s15 = int_to_ptr.vmem [resolvable:$true] %s28_s15 }
  0x17   :  { %s829_s19 = scalar_lea.hbm %s1198_s5, 1024 }
  0x18   :  { %p830_p8 = scmp.ne.s32.totalorder %s1198_s5, %s829_s19  ;;  %p833_p9 = scmp.lt.u32.totalorder %s829_s19, %s1198_s5 }
  0x1a   :  { %p835_p10 = pnand %p833_p9, %p830_p8 }
  0x1c   :  { %838 = shalt.err (!%p835_p10)
}
  0x1d   :  { %s839_s1 = scalar_lea.vmem %s66_s13, 1024  ;;  %p844_p12 = scmp.lt.s32.totalorder %s66_s13, %s66_s13 }
  0x1e   :  { %p840_p11 = scmp.ne.s32.totalorder %s66_s13, %s839_s1  ;;  %p845_p13 = scmp.lt.s32.totalorder %s839_s1, %s839_s1 }
  0x20   :  { %p846_p0 = por %p845_p13, %p844_p12 }
  0x22   :  { %p847_p1 = pnand %p846_p0, %p840_p11 }
  0x24   :  { %850 = shalt.err (!%p847_p1)
}
  0x25   :  { %71 = dma.hbm_to_vmem [thread:$0]  %s1198_s5, 1024, %s66_s13, [#allocation9], %s972_s27, %s972_s27, %s973_s28  }
  0x26   :  { %s851_s29 = scalar_lea.hbm %s1193_s0, 64 }
  0x27   :  { %p852_p2 = scmp.ne.s32.totalorder %s1193_s0, %s851_s29  ;;  %p855_p3 = scmp.lt.u32.totalorder %s851_s29, %s1193_s0 }
  0x29   :  { %p857_p4 = pnand %p855_p3, %p852_p2 }
  0x2b   :  { %860 = shalt.err (!%p857_p4)
}
  0x2c   :  { %s861_s17 = scalar_lea.vmem %s29_s15, 64  ;;  %p866_p6 = scmp.lt.s32.totalorder %s29_s15, %s29_s15 }
  0x2d   :  { %p862_p5 = scmp.ne.s32.totalorder %s29_s15, %s861_s17  ;;  %p867_p7 = scmp.lt.s32.totalorder %s861_s17, %s861_s17 }
  0x2f   :  { %p868_p8 = por %p867_p7, %p866_p6 }
  0x31   :  { %p869_p9 = pnand %p868_p8, %p862_p5 }
  0x33   :  { %872 = shalt.err (!%p869_p9)
}
  0x34   :  { %31 = dma.hbm_to_vmem [thread:$0]  %s1193_s0, 64, %s29_s15, [#allocation3]  }
  0x35   :  { %s976_s19 = smov [#allocation7]   ;;  %s977_s21 = smov [#allocation10]  }
  0x36   :  { %s51_s20 = sshll.u32 %s976_s19, 4  ;;  %s79_s22 = sshll.u32 %s977_s21, 4  ;;  %s52_s20 = int_to_ptr.vmem [resolvable:$true] %s51_s20  ;;  %s80_s22 = int_to_ptr.vmem [resolvable:$true] %s79_s22 }
  0x37   :  { %s873_s18 = scalar_lea.hbm %s1196_s3, 1024 }
  0x38   :  { %p874_p10 = scmp.ne.s32.totalorder %s1196_s3, %s873_s18  ;;  %p877_p11 = scmp.lt.u32.totalorder %s873_s18, %s1196_s3 }
  0x3a   :  { %p879_p12 = pnand %p877_p11, %p874_p10 }
  0x3c   :  { %882 = shalt.err (!%p879_p12)
}
  0x3d   :  { %s883_s0 = scalar_lea.vmem %s52_s20, 1024  ;;  %p888_p0 = scmp.lt.s32.totalorder %s52_s20, %s52_s20 }
  0x3e   :  { %p884_p13 = scmp.ne.s32.totalorder %s52_s20, %s883_s0  ;;  %p889_p1 = scmp.lt.s32.totalorder %s883_s0, %s883_s0 }
  0x40   :  { %p890_p2 = por %p889_p1, %p888_p0 }
  0x42   :  { %p891_p3 = pnand %p890_p2, %p884_p13 }
  0x44   :  { %894 = shalt.err (!%p891_p3)
}
  0x45   :  { %57 = dma.hbm_to_vmem [thread:$0]  %s1196_s3, 1024, %s52_s20, [#allocation6], %s972_s27, %s972_s27, %s973_s28  }
  0x46   :  { %s895_s16 = scalar_lea.hbm %s1200_s7, 1024 }
  0x47   :  { %p896_p4 = scmp.ne.s32.totalorder %s1200_s7, %s895_s16  ;;  %p899_p5 = scmp.lt.u32.totalorder %s895_s16, %s1200_s7 }
  0x49   :  { %p901_p6 = pnand %p899_p5, %p896_p4 }
  0x4b   :  { %904 = shalt.err (!%p901_p6)
}
  0x4c   :  { %s905_s21 = scalar_lea.vmem %s80_s22, 1024  ;;  %p910_p8 = scmp.lt.s32.totalorder %s80_s22, %s80_s22 }
  0x4d   :  { %p906_p7 = scmp.ne.s32.totalorder %s80_s22, %s905_s21  ;;  %p911_p9 = scmp.lt.s32.totalorder %s905_s21, %s905_s21 }
  0x4f   :  { %p912_p10 = por %p911_p9, %p910_p8 }
  0x51   :  { %p913_p11 = pnand %p912_p10, %p906_p7 }
  0x53   :  { %916 = shalt.err (!%p913_p11)
}
  0x54   :  { %85 = dma.hbm_to_vmem [thread:$0]  %s1200_s7, 1024, %s80_s22, [#allocation9], %s972_s27, %s972_s27, %s973_s28  }
  0x55   :  { %961 = dma.done.wait [#allocation3], 64  }
  0x56   :  { %962 = vsyncadd [#allocation3], 4294967232 }
  0x57   :  { %963 = dma.done.wait [#allocation6], 2048  }
  0x58   :  { %964 = vsyncadd [#allocation6], 4294965248 }
  0x59   :  { %965 = dma.done.wait [#allocation9], 2048  }
  0x5a   :  { %966 = vsyncadd [#allocation9], 4294965248  ;;  %v978_v0 = vmov 0.0   ;;  %vm979_vm0 = vmmov 0   ;;  %v771_v1 = vld [vmem:[#allocation5] sm:$0xff]   ;;  %v772_v2 = vld [vmem:[#allocation5 + $0x8] sm:$0xff]  }
  0x5b   :  { %680 = vmatprep.subr.bf16.mxu0 %v978_v0  ;;  %696 = vmatprep.mubr.msk.bf16.mxu0 %vm979_vm0, %v978_v0  ;;  %v773_v3 = vld [vmem:[#allocation5 + $0x10] sm:$0xff]   ;;  %v779_v4 = vld [vmem:[#allocation7] sm:$0xff]   ;;  %v774_v5 = vld [vmem:[#allocation5 + $0x18] sm:$0xff]  }
  0x5c   :  { %700 = vmatprep.subr.bf16.mxu1 %v978_v0  ;;  %716 = vmatprep.mubr.msk.bf16.mxu1 %vm979_vm0, %v978_v0  ;;  %v780_v6 = vld [vmem:[#allocation7 + $0x8] sm:$0xff]   ;;  %v775_v7 = vld [vmem:[#allocation5 + $0x20] sm:$0xff]   ;;  %v781_v8 = vld [vmem:[#allocation7 + $0x10] sm:$0xff]  }
  0x5d   :  { %681 = vmatpush3.bf16.msra.mxu0 %v771_v1  ;;  %701 = vmatpush3.bf16.msra.mxu1 %v779_v4  ;;  %v776_v9 = vld [vmem:[#allocation5 + $0x28] sm:$0xff]   ;;  %v782_v10 = vld [vmem:[#allocation7 + $0x18] sm:$0xff]   ;;  %v777_v11 = vld [vmem:[#allocation5 + $0x30] sm:$0xff]  }
  0x5e   :  { %682 = vmatprep.subr.bf16.mxu0 %v978_v0  ;;  %702 = vmatprep.subr.bf16.mxu1 %v978_v0  ;;  %v783_v12 = vld [vmem:[#allocation7 + $0x20] sm:$0xff]   ;;  %v778_v13 = vld [vmem:[#allocation5 + $0x38] sm:$0xff]   ;;  %v784_v14 = vld [vmem:[#allocation7 + $0x28] sm:$0xff]  }
  0x5f   :  { %v106_v15 = vld [vmem:[#allocation2] sm:$0xf]  ;;  %v785_v16 = vld [vmem:[#allocation7 + $0x30] sm:$0xff]   ;;  %v787_v18 = vld [vmem:[#allocation8] sm:$0xff]  }
  0x60   :  { %v786_v17 = vld [vmem:[#allocation7 + $0x38] sm:$0xff]   ;;  %v788_v19 = vld [vmem:[#allocation8 + $0x8] sm:$0xff]   ;;  %v789_v20 = vld [vmem:[#allocation8 + $0x10] sm:$0xff]  }
  0x61   :  { %683 = vmatpush3.bf16.msra.mxu0 %v772_v2  ;;  %703 = vmatpush3.bf16.msra.mxu1 %v780_v6  ;;  %v790_v21 = vld [vmem:[#allocation8 + $0x18] sm:$0xff]   ;;  %v791_v22 = vld [vmem:[#allocation8 + $0x20] sm:$0xff]   ;;  %v792_v23 = vld [vmem:[#allocation8 + $0x28] sm:$0xff]  }
  0x62   :  { %684 = vmatprep.subr.bf16.mxu0 %v978_v0  ;;  %704 = vmatprep.subr.bf16.mxu1 %v978_v0  ;;  %v607_v24 = vld [vmem:[%s1195_s2] ss:$0 sm:$0xff]  ;;  %v793_v32 = vld [vmem:[#allocation8 + $0x30] sm:$0xff]   ;;  %v795_v34 = vld [vmem:[#allocation10] sm:$0xff]  }
  0x63   :  { %v794_v33 = vld [vmem:[#allocation8 + $0x38] sm:$0xff]   ;;  %v796_v35 = vld [vmem:[#allocation10 + $0x8] sm:$0xff]   ;;  %v797_v36 = vld [vmem:[#allocation10 + $0x10] sm:$0xff]  }
  0x64   :  { %v798_v37 = vld [vmem:[#allocation10 + $0x18] sm:$0xff]   ;;  %v799_v38 = vld [vmem:[#allocation10 + $0x20] sm:$0xff]   ;;  %v800_v39 = vld [vmem:[#allocation10 + $0x28] sm:$0xff]  }
  0x65   :  { %685 = vmatpush3.bf16.msra.mxu0 %v773_v3  ;;  %705 = vmatpush3.bf16.msra.mxu1 %v781_v8  ;;  %v616_v40 = vld [vmem:[%s1197_s4] ss:$0 sm:$0xff]  ;;  %v801_v48 = vld [vmem:[#allocation10 + $0x30] sm:$0xff]  }
  0x66   :  { %686 = vmatprep.subr.bf16.mxu0 %v978_v0  ;;  %706 = vmatprep.subr.bf16.mxu1 %v978_v0  ;;  %v802_v49 = vld [vmem:[#allocation10 + $0x38] sm:$0xff]  }
  0x67   :  { %v625_v50 = vld [vmem:[%s1199_s6] ss:$0 sm:$0xff]  ;;  %s980_s6 = smov [#allocation12]  }
  0x68   :  { %v634_v58 = vld [vmem:[%s1201_s8] ss:$0 sm:$0xff]  ;;  %s592_s25 = sshll.u32 %s980_s6, 4  ;;  %s593_s25 = int_to_ptr.vmem [resolvable:$true] %s592_s25 }
  0x69   :  { %687 = vmatpush3.bf16.msra.mxu0 %v774_v5  ;;  %707 = vmatpush3.bf16.msra.mxu1 %v782_v10  ;;  %v643_v60 = vld [vmem:[%s1202_s9] ss:$0 sm:$0xff]  ;;  %s917_s8 = scalar_lea.vmem %s593_s25, 128  ;;  %p922_p13 = scmp.lt.s32.totalorder %s593_s25, %s593_s25 }
  0x6a   :  { %688 = vmatprep.subr.bf16.mxu0 %v978_v0  ;;  %708 = vmatprep.subr.bf16.mxu1 %v978_v0  ;;  %p918_p12 = scmp.ne.s32.totalorder %s593_s25, %s917_s8  ;;  %p923_p0 = scmp.lt.s32.totalorder %s917_s8, %s917_s8 }
  0x6c   :  { %p924_p1 = por %p923_p0, %p922_p13 }
  0x6d   :  { %689 = vmatpush3.bf16.msra.mxu0 %v775_v7  ;;  %709 = vmatpush3.bf16.msra.mxu1 %v783_v12 }
  0x6e   :  { %690 = vmatprep.subr.bf16.mxu0 %v978_v0  ;;  %710 = vmatprep.subr.bf16.mxu1 %v978_v0  ;;  %p925_p2 = pnand %p924_p1, %p918_p12 }
  0x71   :  { %691 = vmatpush3.bf16.msra.mxu0 %v776_v9  ;;  %711 = vmatpush3.bf16.msra.mxu1 %v784_v14 }
  0x72   :  { %692 = vmatprep.subr.bf16.mxu0 %v978_v0  ;;  %712 = vmatprep.subr.bf16.mxu1 %v978_v0 }
  0x75   :  { %693 = vmatpush3.bf16.msra.mxu0 %v777_v11  ;;  %713 = vmatpush3.bf16.msra.mxu1 %v785_v16 }
  0x76   :  { %694 = vmatprep.subr.bf16.mxu0 %v978_v0  ;;  %714 = vmatprep.subr.bf16.mxu1 %v978_v0 }
  0x79   :  { %695 = vmatpush3.bf16.msra.mxu0 %v778_v13  ;;  %715 = vmatpush3.bf16.msra.mxu1 %v786_v17 }
  0x7a   :  { %720 = vmatprep.subr.bf16.mxu0 %v978_v0  ;;  %740 = vmatprep.subr.bf16.mxu1 %v978_v0 }
  0x7c   :  { %697 = vmatmul.mubr.bf16.vlgmr.msra.gmra.mrb[0].mxu0 %v106_v15 }
  0x7d   :  { %736 = vmatprep.mubr.msk.bf16.mxu0 %vm979_vm0, %v978_v0  ;;  %721 = vmatpush3.bf16.msra.mxu0 %v787_v18 }
  0x7e   :  { %722 = vmatprep.subr.bf16.mxu0 %v978_v0 }
  0x81   :  { %723 = vmatpush3.bf16.msra.mxu0 %v788_v19 }
  0x82   :  { %724 = vmatprep.subr.bf16.mxu0 %v978_v0 }
  0x85   :  { %725 = vmatpush3.bf16.msra.mxu0 %v789_v20 }
  0x86   :  { %726 = vmatprep.subr.bf16.mxu0 %v978_v0 }
  0x89   :  { %727 = vmatpush3.bf16.msra.mxu0 %v790_v21 }
  0x8a   :  { %728 = vmatprep.subr.bf16.mxu0 %v978_v0 }
  0x8d   :  { %729 = vmatpush3.bf16.msra.mxu0 %v791_v22 }
  0x8e   :  { %730 = vmatprep.subr.bf16.mxu0 %v978_v0 }
  0x91   :  { %731 = vmatpush3.bf16.msra.mxu0 %v792_v23 }
  0x92   :  { %732 = vmatprep.subr.bf16.mxu0 %v978_v0 }
  0x95   :  { %733 = vmatpush3.bf16.msra.mxu0 %v793_v32 }
  0x96   :  { %734 = vmatprep.subr.bf16.mxu0 %v978_v0 }
  0x99   :  { %735 = vmatpush3.bf16.msra.mxu0 %v794_v33 }
 0x14f   :  { %v212_v25 = vpop.f32.mrb[0].mxu0 }
 0x150   :  { %v213_v26 = vadd.f32 %v607_v24, %v212_v25  ;;  %v698_v27 = vpop.f32.mrb[1].mxu0 }
 0x151   :  { %v215_v28 = vpop.f32.mrb[2].mxu0 }
 0x152   :  { %v218_v29 = vmax.f32 %v213_v26, 0.0  ;;  %v699_v30 = vpop.f32.mrb[3].mxu0 }
 0x154   :  { %v219_v31 = vpack.c.bf16 %v218_v29, %v218_v29 }
 0x156   :  { %717 = vmatmul.mubr.bf16.vlgmr.msra.gmra.mrb[0].mxu1 %v219_v31 }
 0x157   :  { %756 = vmatprep.mubr.msk.bf16.mxu1 %vm979_vm0, %v978_v0  ;;  %741 = vmatpush3.bf16.msra.mxu1 %v795_v34 }
 0x158   :  { %742 = vmatprep.subr.bf16.mxu1 %v978_v0 }
 0x15b   :  { %743 = vmatpush3.bf16.msra.mxu1 %v796_v35 }
 0x15c   :  { %744 = vmatprep.subr.bf16.mxu1 %v978_v0 }
 0x15f   :  { %745 = vmatpush3.bf16.msra.mxu1 %v797_v36 }
 0x160   :  { %746 = vmatprep.subr.bf16.mxu1 %v978_v0 }
 0x163   :  { %747 = vmatpush3.bf16.msra.mxu1 %v798_v37 }
 0x164   :  { %748 = vmatprep.subr.bf16.mxu1 %v978_v0 }
 0x167   :  { %749 = vmatpush3.bf16.msra.mxu1 %v799_v38 }
 0x168   :  { %750 = vmatprep.subr.bf16.mxu1 %v978_v0 }
 0x16b   :  { %751 = vmatpush3.bf16.msra.mxu1 %v800_v39 }
 0x16c   :  { %752 = vmatprep.subr.bf16.mxu1 %v978_v0 }
 0x16f   :  { %753 = vmatpush3.bf16.msra.mxu1 %v801_v48 }
 0x170   :  { %754 = vmatprep.subr.bf16.mxu1 %v978_v0 }
 0x173   :  { %755 = vmatpush3.bf16.msra.mxu1 %v802_v49 }
 0x229   :  { %v325_v41 = vpop.f32.mrb[0].mxu1 }
 0x22a   :  { %v326_v42 = vadd.f32 %v616_v40, %v325_v41  ;;  %v718_v43 = vpop.f32.mrb[1].mxu1 }
 0x22b   :  { %v328_v44 = vpop.f32.mrb[2].mxu1 }
 0x22c   :  { %v331_v45 = vmax.f32 %v326_v42, 0.0  ;;  %v719_v46 = vpop.f32.mrb[3].mxu1 }
 0x22e   :  { %v333_v47 = vpack.c.bf16 %v331_v45, %v331_v45  ;;  %332 = vst [vmem:[#allocation12] sm:$0xff] %v331_v45 }
 0x230   :  { %737 = vmatmul.mubr.bf16.vlgmr.msra.gmra.mrb[4].mxu0 %v333_v47 }
 0x303   :  { %v439_v51 = vpop.f32.mrb[4].mxu0 }
 0x304   :  { %v440_v52 = vadd.f32 %v625_v50, %v439_v51  ;;  %v738_v53 = vpop.f32.mrb[5].mxu0 }
 0x305   :  { %v442_v54 = vpop.f32.mrb[6].mxu0 }
 0x306   :  { %v445_v55 = vmax.f32 %v440_v52, 0.0  ;;  %v739_v56 = vpop.f32.mrb[7].mxu0 }
 0x308   :  { %v446_v57 = vpack.c.bf16 %v445_v55, %v445_v55 }
 0x30a   :  { %757 = vmatmul.mubr.bf16.vlgmr.msra.gmra.mrb[4].mxu1 %v446_v57 }
 0x3dd   :  { %v552_v59 = vpop.f32.mrb[4].mxu1 }
 0x3de   :  { %v553_v61 = vadd.f32 %v634_v58, %v552_v59  ;;  %v758_v62 = vpop.f32.mrb[5].mxu1 }
 0x3df   :  { %v555_v63 = vpop.f32.mrb[6].mxu1 }
 0x3e0   :  { %v759_v0 = vpop.f32.mrb[7].mxu1  ;;  %v565_v1 = vadd.f32 %v643_v60, %v553_v61 }
 0x3e2   :  { %566 = vmax.xlane.f32.xlu0 %v565_v1 }
 0x46f   :  { %v567_v2 = vpop.xlane.xlu0 %566 }
 0x470   :  { %v568_v3 = vsub.f32 %v565_v1, %v567_v2 }
 0x472   :  { %v569_v4 = vmul.f32 1.442695, %v568_v3 }
 0x474   :  { %803 = vpow2.f32 %v569_v4 }
 0x47e   :  { %v804_v5 = vpop.eup %803 }
 0x47f   :  { %571 = vadd.xlane.f32.xlu0 %v804_v5 }
 0x480   :  { %928 = shalt.err (!%p925_p2)
}
 0x481   :  { %s929_s29 = scalar_lea.hbm %s1204_s11, 128 }
 0x482   :  { %p930_p3 = scmp.ne.s32.totalorder %s1204_s11, %s929_s29  ;;  %p933_p4 = scmp.lt.u32.totalorder %s929_s29, %s1204_s11 }
 0x484   :  { %p935_p5 = pnand %p933_p4, %p930_p3 }
 0x486   :  { %938 = shalt.err (!%p935_p5)
}
 0x487   :  { %595 = dma.vmem_to_hbm [thread:$0]  %s593_s25, 128, %s1204_s11, [#allocation13]  }
 0x488   :  { %s981_s17 = smov [#allocation11]  }
 0x489   :  { %s582_s5 = sshll.u32 %s981_s17, 4  ;;  %s583_s5 = int_to_ptr.vmem [resolvable:$true] %s582_s5 }
 0x48a   :  { %s939_s13 = scalar_lea.vmem %s583_s5, 128  ;;  %p944_p7 = scmp.lt.s32.totalorder %s583_s5, %s583_s5 }
 0x48b   :  { %p940_p6 = scmp.ne.s32.totalorder %s583_s5, %s939_s13  ;;  %p945_p8 = scmp.lt.s32.totalorder %s939_s13, %s939_s13 }
 0x48d   :  { %p946_p9 = por %p945_p8, %p944_p7 }
 0x48f   :  { %p947_p10 = pnand %p946_p9, %p940_p6 }
 0x50c   :  { %v572_v6 = vpop.xlane.xlu0 %571 }
 0x50d   :  { %805 = vrcp.f32 %v572_v6 }
 0x517   :  { %v806_v7 = vpop.eup %805 }
 0x518   :  { %v574_v8 = vmul.f32 %v806_v7, %v804_v5 }
 0x51a   :  { %575 = vst [vmem:[#allocation11] sm:$0xff] %v574_v8 }
 0x51b   :  { %950 = shalt.err (!%p947_p10)
}
 0x51c   :  { %s951_s3 = scalar_lea.hbm %s1203_s10, 128 }
 0x51d   :  { %p952_p11 = scmp.ne.s32.totalorder %s1203_s10, %s951_s3  ;;  %p955_p12 = scmp.lt.u32.totalorder %s951_s3, %s1203_s10 }
 0x51f   :  { %p957_p13 = pnand %p955_p12, %p952_p11 }
 0x521   :  { %960 = shalt.err (!%p957_p13)
}
 0x522   :  { %585 = dma.vmem_to_hbm [thread:$0]  %s583_s5, 128, %s1203_s10, [#allocation4]  }
 0x523   :  { %967 = dma.done.wait [#allocation4], 128  }
 0x524   :  { %968 = vsyncadd [#allocation4], 4294967168 }
 0x525   :  { %969 = dma.done.wait [#allocation13], 128  }
 0x526   :  { %970 = vsyncadd [#allocation13], 4294967168 }
 0x527   :  { %602 = vsyncpa [#allocation3], 1 }
 0x528   :  { %603 = vsyncpa [#allocation6], 1 }
 0x529   :  { %604 = vsyncpa [#allocation9], 1 }
 0x52a   :  { %605 = vsyncpa [#allocation4], 1 }
 0x52b   :  { %606 = vsyncpa [#allocation13], 1 }

// kernel: tpu_custom_call.1
= control target key start
LH: loop header
LB: loop body
LE: loop exit
PB: predicated region body
PF: predicated region fallthrough
CT: control target
= control target key end

     0   :  { %17 = vsyncpa [#allocation3], 0  ;;  %s1193_s0 = inlined_call_operand.hbm [shape: bf16[8,128], index: 0, kind: input, shape index: {}]   ;;  %s1194_s1 = inlined_call_operand.hbm [shape: bf16[128,128], index: 1, kind: input, shape index: {}]   ;;  %s1195_s2 = inlined_call_operand.vmem [shape: f32[1,128], index: 2, kind: input, shape index: {}]   ;;  %s1196_s3 = inlined_call_operand.hbm [shape: bf16[128,128], index: 3, kind: input, shape index: {}]   ;;  %s1197_s4 = inlined_call_operand.vmem [shape: f32[1,128], index: 4, kind: input, shape index: {}]   ;;  %s1198_s5 = inlined_call_operand.hbm [shape: bf16[128,128], index: 5, kind: input, shape index: {}]   ;;  %s1199_s6 = inlined_call_operand.vmem [shape: f32[1,128], index: 6, kind: input, shape index: {}]   ;;  %s1200_s7 = inlined_call_operand.hbm [shape: bf16[128,128], index: 7, kind: input, shape index: {}]   ;;  %s1201_s8 = inlined_call_operand.vmem [shape: f32[1,128], index: 8, kind: input, shape index: {}]   ;;  %s1202_s9 = inlined_call_operand.vmem [shape: f32[1,128], index: 9, kind: input, shape index: {}]   ;;  %s1203_s10 = inlined_call_operand.hbm [shape: f32[8,128], index: 10, kind: output, shape index: {0}]   ;;  %s1204_s11 = inlined_call_operand.hbm [shape: f32[8,128], index: 11, kind: output, shape index: {1}]  }
   0x1   :  { %18 = vsyncpa [#allocation6], 0 }
   0x2   :  { %19 = vsyncpa [#allocation9], 0 }
   0x3   :  { %20 = vsyncpa [#allocation4], 0 }
   0x4   :  { %21 = vsyncpa [#allocation13], 0  ;;  %s971_s17 = smov [#allocation5]   ;;  %s807_s21 = scalar_lea.hbm %s1194_s1, 1024 }
   0x5   :  { %s37_s18 = sshll.u32 %s971_s17, 4  ;;  %p808_p0 = scmp.ne.s32.totalorder %s1194_s1, %s807_s21  ;;  %s38_s18 = int_to_ptr.vmem [resolvable:$true] %s37_s18 }
   0x6   :  { %p811_p1 = scmp.lt.u32.totalorder %s807_s21, %s1194_s1 }
   0x8   :  { %p813_p2 = pnand %p811_p1, %p808_p0 }
   0xa   :  { %816 = shalt.err (!%p813_p2)
}
   0xb   :  { %s817_s26 = scalar_lea.vmem %s38_s18, 1024  ;;  %p822_p4 = scmp.lt.s32.totalorder %s38_s18, %s38_s18 }
   0xc   :  { %p818_p3 = scmp.ne.s32.totalorder %s38_s18, %s817_s26  ;;  %p823_p5 = scmp.lt.s32.totalorder %s817_s26, %s817_s26 }
   0xe   :  { %p824_p6 = por %p823_p5, %p822_p4 }
  0x10   :  { %p825_p7 = pnand %p824_p6, %p818_p3 }
  0x12   :  { %828 = shalt.err (!%p825_p7)
}
  0x13   :  { %s972_s27 = smov 64   ;;  %s973_s28 = smov 4  }
  0x14   :  { %43 = dma.hbm_to_vmem [thread:$0]  %s1194_s1, 1024, %s38_s18, [#allocation6], %s972_s27, %s972_s27, %s973_s28  }
  0x15   :  { %s974_s12 = smov [#allocation8]   ;;  %s975_s14 = smov [#allocation2]  }
  0x16   :  { %s65_s13 = sshll.u32 %s974_s12, 4  ;;  %s28_s15 = sshll.u32 %s975_s14, 4  ;;  %s66_s13 = int_to_ptr.vmem [resolvable:$true] %s65_s13  ;;  %s29_s15 = int_to_ptr.vmem [resolvable:$true] %s28_s15 }
  0x17   :  { %s829_s19 = scalar_lea.hbm %s1198_s5, 1024 }
  0x18   :  { %p830_p8 = scmp.ne.s32.totalorder %s1198_s5, %s829_s19  ;;  %p833_p9 = scmp.lt.u32.totalorder %s829_s19, %s1198_s5 }
  0x1a   :  { %p835_p10 = pnand %p833_p9, %p830_p8 }
  0x1c   :  { %838 = shalt.err (!%p835_p10)
}
  0x1d   :  { %s839_s1 = scalar_lea.vmem %s66_s13, 1024  ;;  %p844_p12 = scmp.lt.s32.totalorder %s66_s13, %s66_s13 }
  0x1e   :  { %p840_p11 = scmp.ne.s32.totalorder %s66_s13, %s839_s1  ;;  %p845_p13 = scmp.lt.s32.totalorder %s839_s1, %s839_s1 }
  0x20   :  { %p846_p0 = por %p845_p13, %p844_p12 }
  0x22   :  { %p847_p1 = pnand %p846_p0, %p840_p11 }
  0x24   :  { %850 = shalt.err (!%p847_p1)
}
  0x25   :  { %71 = dma.hbm_to_vmem [thread:$0]  %s1198_s5, 1024, %s66_s13, [#allocation9], %s972_s27, %s972_s27, %s973_s28  }
  0x26   :  { %s851_s29 = scalar_lea.hbm %s1193_s0, 64 }
  0x27   :  { %p852_p2 = scmp.ne.s32.totalorder %s1193_s0, %s851_s29  ;;  %p855_p3 = scmp.lt.u32.totalorder %s851_s29, %s1193_s0 }
  0x29   :  { %p857_p4 = pnand %p855_p3, %p852_p2 }
  0x2b   :  { %860 = shalt.err (!%p857_p4)
}
  0x2c   :  { %s861_s17 = scalar_lea.vmem %s29_s15, 64  ;;  %p866_p6 = scmp.lt.s32.totalorder %s29_s15, %s29_s15 }
  0x2d   :  { %p862_p5 = scmp.ne.s32.totalorder %s29_s15, %s861_s17  ;;  %p867_p7 = scmp.lt.s32.totalorder %s861_s17, %s861_s17 }
  0x2f   :  { %p868_p8 = por %p867_p7, %p866_p6 }
  0x31   :  { %p869_p9 = pnand %p868_p8, %p862_p5 }
  0x33   :  { %872 = shalt.err (!%p869_p9)
}
  0x34   :  { %31 = dma.hbm_to_vmem [thread:$0]  %s1193_s0, 64, %s29_s15, [#allocation3]  }
  0x35   :  { %s976_s19 = smov [#allocation7]   ;;  %s977_s21 = smov [#allocation10]  }
  0x36   :  { %s51_s20 = sshll.u32 %s976_s19, 4  ;;  %s79_s22 = sshll.u32 %s977_s21, 4  ;;  %s52_s20 = int_to_ptr.vmem [resolvable:$true] %s51_s20  ;;  %s80_s22 = int_to_ptr.vmem [resolvable:$true] %s79_s22 }
  0x37   :  { %s873_s18 = scalar_lea.hbm %s1196_s3, 1024 }
  0x38   :  { %p874_p10 = scmp.ne.s32.totalorder %s1196_s3, %s873_s18  ;;  %p877_p11 = scmp.lt.u32.totalorder %s873_s18, %s1196_s3 }
  0x3a   :  { %p879_p12 = pnand %p877_p11, %p874_p10 }
  0x3c   :  { %882 = shalt.err (!%p879_p12)
}
  0x3d   :  { %s883_s0 = scalar_lea.vmem %s52_s20, 1024  ;;  %p888_p0 = scmp.lt.s32.totalorder %s52_s20, %s52_s20 }
  0x3e   :  { %p884_p13 = scmp.ne.s32.totalorder %s52_s20, %s883_s0  ;;  %p889_p1 = scmp.lt.s32.totalorder %s883_s0, %s883_s0 }
  0x40   :  { %p890_p2 = por %p889_p1, %p888_p0 }
  0x42   :  { %p891_p3 = pnand %p890_p2, %p884_p13 }
  0x44   :  { %894 = shalt.err (!%p891_p3)
}
  0x45   :  { %57 = dma.hbm_to_vmem [thread:$0]  %s1196_s3, 1024, %s52_s20, [#allocation6], %s972_s27, %s972_s27, %s973_s28  }
  0x46   :  { %s895_s16 = scalar_lea.hbm %s1200_s7, 1024 }
  0x47   :  { %p896_p4 = scmp.ne.s32.totalorder %s1200_s7, %s895_s16  ;;  %p899_p5 = scmp.lt.u32.totalorder %s895_s16, %s1200_s7 }
  0x49   :  { %p901_p6 = pnand %p899_p5, %p896_p4 }
  0x4b   :  { %904 = shalt.err (!%p901_p6)
}
  0x4c   :  { %s905_s21 = scalar_lea.vmem %s80_s22, 1024  ;;  %p910_p8 = scmp.lt.s32.totalorder %s80_s22, %s80_s22 }
  0x4d   :  { %p906_p7 = scmp.ne.s32.totalorder %s80_s22, %s905_s21  ;;  %p911_p9 = scmp.lt.s32.totalorder %s905_s21, %s905_s21 }
  0x4f   :  { %p912_p10 = por %p911_p9, %p910_p8 }
  0x51   :  { %p913_p11 = pnand %p912_p10, %p906_p7 }
  0x53   :  { %916 = shalt.err (!%p913_p11)
}
  0x54   :  { %85 = dma.hbm_to_vmem [thread:$0]  %s1200_s7, 1024, %s80_s22, [#allocation9], %s972_s27, %s972_s27, %s973_s28  }
  0x55   :  { %961 = dma.done.wait [#allocation3], 64  }
  0x56   :  { %962 = vsyncadd [#allocation3], 4294967232 }
  0x57   :  { %963 = dma.done.wait [#allocation6], 2048  }
  0x58   :  { %964 = vsyncadd [#allocation6], 4294965248 }
  0x59   :  { %965 = dma.done.wait [#allocation9], 2048  }
  0x5a   :  { %966 = vsyncadd [#allocation9], 4294965248  ;;  %v978_v0 = vmov 0.0   ;;  %vm979_vm0 = vmmov 0   ;;  %v771_v1 = vld [vmem:[#allocation5] sm:$0xff]   ;;  %v772_v2 = vld [vmem:[#allocation5 + $0x8] sm:$0xff]  }
  0x5b   :  { %680 = vmatprep.subr.bf16.mxu0 %v978_v0  ;;  %696 = vmatprep.mubr.msk.bf16.mxu0 %vm979_vm0, %v978_v0  ;;  %v773_v3 = vld [vmem:[#allocation5 + $0x10] sm:$0xff]   ;;  %v779_v4 = vld [vmem:[#allocation7] sm:$0xff]   ;;  %v774_v5 = vld [vmem:[#allocation5 + $0x18] sm:$0xff]  }
  0x5c   :  { %700 = vmatprep.subr.bf16.mxu1 %v978_v0  ;;  %716 = vmatprep.mubr.msk.bf16.mxu1 %vm979_vm0, %v978_v0  ;;  %v780_v6 = vld [vmem:[#allocation7 + $0x8] sm:$0xff]   ;;  %v775_v7 = vld [vmem:[#allocation5 + $0x20] sm:$0xff]   ;;  %v781_v8 = vld [vmem:[#allocation7 + $0x10] sm:$0xff]  }
  0x5d   :  { %681 = vmatpush3.bf16.msra.mxu0 %v771_v1  ;;  %701 = vmatpush3.bf16.msra.mxu1 %v779_v4  ;;  %v776_v9 = vld [vmem:[#allocation5 + $0x28] sm:$0xff]   ;;  %v782_v10 = vld [vmem:[#allocation7 + $0x18] sm:$0xff]   ;;  %v777_v11 = vld [vmem:[#allocation5 + $0x30] sm:$0xff]  }
  0x5e   :  { %682 = vmatprep.subr.bf16.mxu0 %v978_v0  ;;  %702 = vmatprep.subr.bf16.mxu1 %v978_v0  ;;  %v783_v12 = vld [vmem:[#allocation7 + $0x20] sm:$0xff]   ;;  %v778_v13 = vld [vmem:[#allocation5 + $0x38] sm:$0xff]   ;;  %v784_v14 = vld [vmem:[#allocation7 + $0x28] sm:$0xff]  }
  0x5f   :  { %v106_v15 = vld [vmem:[#allocation2] sm:$0xf]  ;;  %v785_v16 = vld [vmem:[#allocation7 + $0x30] sm:$0xff]   ;;  %v787_v18 = vld [vmem:[#allocation8] sm:$0xff]  }
  0x60   :  { %v786_v17 = vld [vmem:[#allocation7 + $0x38] sm:$0xff]   ;;  %v788_v19 = vld [vmem:[#allocation8 + $0x8] sm:$0xff]   ;;  %v789_v20 = vld [vmem:[#allocation8 + $0x10] sm:$0xff]  }
  0x61   :  { %683 = vmatpush3.bf16.msra.mxu0 %v772_v2  ;;  %703 = vmatpush3.bf16.msra.mxu1 %v780_v6  ;;  %v790_v21 = vld [vmem:[#allocation8 + $0x18] sm:$0xff]   ;;  %v791_v22 = vld [vmem:[#allocation8 + $0x20] sm:$0xff]   ;;  %v792_v23 = vld [vmem:[#allocation8 + $0x28] sm:$0xff]  }
  0x62   :  { %684 = vmatprep.subr.bf16.mxu0 %v978_v0  ;;  %704 = vmatprep.subr.bf16.mxu1 %v978_v0  ;;  %v607_v24 = vld [vmem:[%s1195_s2] ss:$0 sm:$0xff]  ;;  %v793_v32 = vld [vmem:[#allocation8 + $0x30] sm:$0xff]   ;;  %v795_v34 = vld [vmem:[#allocation10] sm:$0xff]  }
  0x63   :  { %v794_v33 = vld [vmem:[#allocation8 + $0x38] sm:$0xff]   ;;  %v796_v35 = vld [vmem:[#allocation10 + $0x8] sm:$0xff]   ;;  %v797_v36 = vld [vmem:[#allocation10 + $0x10] sm:$0xff]  }
  0x64   :  { %v798_v37 = vld [vmem:[#allocation10 + $0x18] sm:$0xff]   ;;  %v799_v38 = vld [vmem:[#allocation10 + $0x20] sm:$0xff]   ;;  %v800_v39 = vld [vmem:[#allocation10 + $0x28] sm:$0xff]  }
  0x65   :  { %685 = vmatpush3.bf16.msra.mxu0 %v773_v3  ;;  %705 = vmatpush3.bf16.msra.mxu1 %v781_v8  ;;  %v616_v40 = vld [vmem:[%s1197_s4] ss:$0 sm:$0xff]  ;;  %v801_v48 = vld [vmem:[#allocation10 + $0x30] sm:$0xff]  }
  0x66   :  { %686 = vmatprep.subr.bf16.mxu0 %v978_v0  ;;  %706 = vmatprep.subr.bf16.mxu1 %v978_v0  ;;  %v802_v49 = vld [vmem:[#allocation10 + $0x38] sm:$0xff]  }
  0x67   :  { %v625_v50 = vld [vmem:[%s1199_s6] ss:$0 sm:$0xff]  ;;  %s980_s6 = smov [#allocation12]  }
  0x68   :  { %v634_v58 = vld [vmem:[%s1201_s8] ss:$0 sm:$0xff]  ;;  %s592_s25 = sshll.u32 %s980_s6, 4  ;;  %s593_s25 = int_to_ptr.vmem [resolvable:$true] %s592_s25 }
  0x69   :  { %687 = vmatpush3.bf16.msra.mxu0 %v774_v5  ;;  %707 = vmatpush3.bf16.msra.mxu1 %v782_v10  ;;  %v643_v60 = vld [vmem:[%s1202_s9] ss:$0 sm:$0xff]  ;;  %s917_s8 = scalar_lea.vmem %s593_s25, 128  ;;  %p922_p13 = scmp.lt.s32.totalorder %s593_s25, %s593_s25 }
  0x6a   :  { %688 = vmatprep.subr.bf16.mxu0 %v978_v0  ;;  %708 = vmatprep.subr.bf16.mxu1 %v978_v0  ;;  %p918_p12 = scmp.ne.s32.totalorder %s593_s25, %s917_s8  ;;  %p923_p0 = scmp.lt.s32.totalorder %s917_s8, %s917_s8 }
  0x6c   :  { %p924_p1 = por %p923_p0, %p922_p13 }
  0x6d   :  { %689 = vmatpush3.bf16.msra.mxu0 %v775_v7  ;;  %709 = vmatpush3.bf16.msra.mxu1 %v783_v12 }
  0x6e   :  { %690 = vmatprep.subr.bf16.mxu0 %v978_v0  ;;  %710 = vmatprep.subr.bf16.mxu1 %v978_v0  ;;  %p925_p2 = pnand %p924_p1, %p918_p12 }
  0x71   :  { %691 = vmatpush3.bf16.msra.mxu0 %v776_v9  ;;  %711 = vmatpush3.bf16.msra.mxu1 %v784_v14 }
  0x72   :  { %692 = vmatprep.subr.bf16.mxu0 %v978_v0  ;;  %712 = vmatprep.subr.bf16.mxu1 %v978_v0 }
  0x75   :  { %693 = vmatpush3.bf16.msra.mxu0 %v777_v11  ;;  %713 = vmatpush3.bf16.msra.mxu1 %v785_v16 }
  0x76   :  { %694 = vmatprep.subr.bf16.mxu0 %v978_v0  ;;  %714 = vmatprep.subr.bf16.mxu1 %v978_v0 }
  0x79   :  { %695 = vmatpush3.bf16.msra.mxu0 %v778_v13  ;;  %715 = vmatpush3.bf16.msra.mxu1 %v786_v17 }
  0x7a   :  { %720 = vmatprep.subr.bf16.mxu0 %v978_v0  ;;  %740 = vmatprep.subr.bf16.mxu1 %v978_v0 }
  0x7c   :  { %697 = vmatmul.mubr.bf16.vlgmr.msra.gmra.mrb[0].mxu0 %v106_v15 }
  0x7d   :  { %736 = vmatprep.mubr.msk.bf16.mxu0 %vm979_vm0, %v978_v0  ;;  %721 = vmatpush3.bf16.msra.mxu0 %v787_v18 }
  0x7e   :  { %722 = vmatprep.subr.bf16.mxu0 %v978_v0 }
  0x81   :  { %723 = vmatpush3.bf16.msra.mxu0 %v788_v19 }
  0x82   :  { %724 = vmatprep.subr.bf16.mxu0 %v978_v0 }
  0x85   :  { %725 = vmatpush3.bf16.msra.mxu0 %v789_v20 }
  0x86   :  { %726 = vmatprep.subr.bf16.mxu0 %v978_v0 }
  0x89   :  { %727 = vmatpush3.bf16.msra.mxu0 %v790_v21 }
  0x8a   :  { %728 = vmatprep.subr.bf16.mxu0 %v978_v0 }
  0x8d   :  { %729 = vmatpush3.bf16.msra.mxu0 %v791_v22 }
  0x8e   :  { %730 = vmatprep.subr.bf16.mxu0 %v978_v0 }
  0x91   :  { %731 = vmatpush3.bf16.msra.mxu0 %v792_v23 }
  0x92   :  { %732 = vmatprep.subr.bf16.mxu0 %v978_v0 }
  0x95   :  { %733 = vmatpush3.bf16.msra.mxu0 %v793_v32 }
  0x96   :  { %734 = vmatprep.subr.bf16.mxu0 %v978_v0 }
  0x99   :  { %735 = vmatpush3.bf16.msra.mxu0 %v794_v33 }
 0x14f   :  { %v212_v25 = vpop.f32.mrb[0].mxu0 }
 0x150   :  { %v213_v26 = vadd.f32 %v607_v24, %v212_v25  ;;  %v698_v27 = vpop.f32.mrb[1].mxu0 }
 0x151   :  { %v215_v28 = vpop.f32.mrb[2].mxu0 }
 0x152   :  { %v218_v29 = vmax.f32 %v213_v26, 0.0  ;;  %v699_v30 = vpop.f32.mrb[3].mxu0 }
 0x154   :  { %v219_v31 = vpack.c.bf16 %v218_v29, %v218_v29 }
 0x156   :  { %717 = vmatmul.mubr.bf16.vlgmr.msra.gmra.mrb[0].mxu1 %v219_v31 }
 0x157   :  { %756 = vmatprep.mubr.msk.bf16.mxu1 %vm979_vm0, %v978_v0  ;;  %741 = vmatpush3.bf16.msra.mxu1 %v795_v34 }
 0x158   :  { %742 = vmatprep.subr.bf16.mxu1 %v978_v0 }
 0x15b   :  { %743 = vmatpush3.bf16.msra.mxu1 %v796_v35 }
 0x15c   :  { %744 = vmatprep.subr.bf16.mxu1 %v978_v0 }
 0x15f   :  { %745 = vmatpush3.bf16.msra.mxu1 %v797_v36 }
 0x160   :  { %746 = vmatprep.subr.bf16.mxu1 %v978_v0 }
 0x163   :  { %747 = vmatpush3.bf16.msra.mxu1 %v798_v37 }
 0x164   :  { %748 = vmatprep.subr.bf16.mxu1 %v978_v0 }
 0x167   :  { %749 = vmatpush3.bf16.msra.mxu1 %v799_v38 }
 0x168   :  { %750 = vmatprep.subr.bf16.mxu1 %v978_v0 }
 0x16b   :  { %751 = vmatpush3.bf16.msra.mxu1 %v800_v39 }
 0x16c   :  { %752 = vmatprep.subr.bf16.mxu1 %v978_v0 }
 0x16f   :  { %753 = vmatpush3.bf16.msra.mxu1 %v801_v48 }
 0x170   :  { %754 = vmatprep.subr.bf16.mxu1 %v978_v0 }
 0x173   :  { %755 = vmatpush3.bf16.msra.mxu1 %v802_v49 }
 0x229   :  { %v325_v41 = vpop.f32.mrb[0].mxu1 }
 0x22a   :  { %v326_v42 = vadd.f32 %v616_v40, %v325_v41  ;;  %v718_v43 = vpop.f32.mrb[1].mxu1 }
 0x22b   :  { %v328_v44 = vpop.f32.mrb[2].mxu1 }
 0x22c   :  { %v331_v45 = vmax.f32 %v326_v42, 0.0  ;;  %v719_v46 = vpop.f32.mrb[3].mxu1 }
 0x22e   :  { %v333_v47 = vpack.c.bf16 %v331_v45, %v331_v45  ;;  %332 = vst [vmem:[#allocation12] sm:$0xff] %v331_v45 }
 0x230   :  { %737 = vmatmul.mubr.bf16.vlgmr.msra.gmra.mrb[4].mxu0 %v333_v47 }
 0x303   :  { %v439_v51 = vpop.f32.mrb[4].mxu0 }
 0x304   :  { %v440_v52 = vadd.f32 %v625_v50, %v439_v51  ;;  %v738_v53 = vpop.f32.mrb[5].mxu0 }
 0x305   :  { %v442_v54 = vpop.f32.mrb[6].mxu0 }
 0x306   :  { %v445_v55 = vmax.f32 %v440_v52, 0.0  ;;  %v739_v56 = vpop.f32.mrb[7].mxu0 }
 0x308   :  { %v446_v57 = vpack.c.bf16 %v445_v55, %v445_v55 }
 0x30a   :  { %757 = vmatmul.mubr.bf16.vlgmr.msra.gmra.mrb[4].mxu1 %v446_v57 }
 0x3dd   :  { %v552_v59 = vpop.f32.mrb[4].mxu1 }
 0x3de   :  { %v553_v61 = vadd.f32 %v634_v58, %v552_v59  ;;  %v758_v62 = vpop.f32.mrb[5].mxu1 }
 0x3df   :  { %v555_v63 = vpop.f32.mrb[6].mxu1 }
 0x3e0   :  { %v759_v0 = vpop.f32.mrb[7].mxu1  ;;  %v565_v1 = vadd.f32 %v643_v60, %v553_v61 }
 0x3e2   :  { %566 = vmax.xlane.f32.xlu0 %v565_v1 }
 0x46f   :  { %v567_v2 = vpop.xlane.xlu0 %566 }
 0x470   :  { %v568_v3 = vsub.f32 %v565_v1, %v567_v2 }
 0x472   :  { %v569_v4 = vmul.f32 1.442695, %v568_v3 }
 0x474   :  { %803 = vpow2.f32 %v569_v4 }
 0x47e   :  { %v804_v5 = vpop.eup %803 }
 0x47f   :  { %571 = vadd.xlane.f32.xlu0 %v804_v5 }
 0x480   :  { %928 = shalt.err (!%p925_p2)
}
 0x481   :  { %s929_s29 = scalar_lea.hbm %s1204_s11, 128 }
 0x482   :  { %p930_p3 = scmp.ne.s32.totalorder %s1204_s11, %s929_s29  ;;  %p933_p4 = scmp.lt.u32.totalorder %s929_s29, %s1204_s11 }
 0x484   :  { %p935_p5 = pnand %p933_p4, %p930_p3 }
 0x486   :  { %938 = shalt.err (!%p935_p5)
}
 0x487   :  { %595 = dma.vmem_to_hbm [thread:$0]  %s593_s25, 128, %s1204_s11, [#allocation13]  }
 0x488   :  { %s981_s17 = smov [#allocation11]  }
 0x489   :  { %s582_s5 = sshll.u32 %s981_s17, 4  ;;  %s583_s5 = int_to_ptr.vmem [resolvable:$true] %s582_s5 }
 0x48a   :  { %s939_s13 = scalar_lea.vmem %s583_s5, 128  ;;  %p944_p7 = scmp.lt.s32.totalorder %s583_s5, %s583_s5 }
 0x48b   :  { %p940_p6 = scmp.ne.s32.totalorder %s583_s5, %s939_s13  ;;  %p945_p8 = scmp.lt.s32.totalorder %s939_s13, %s939_s13 }
 0x48d   :  { %p946_p9 = por %p945_p8, %p944_p7 }
 0x48f   :  { %p947_p10 = pnand %p946_p9, %p940_p6 }
 0x50c   :  { %v572_v6 = vpop.xlane.xlu0 %571 }
 0x50d   :  { %805 = vrcp.f32 %v572_v6 }
 0x517   :  { %v806_v7 = vpop.eup %805 }
 0x518   :  { %v574_v8 = vmul.f32 %v806_v7, %v804_v5 }
 0x51a   :  { %575 = vst [vmem:[#allocation11] sm:$0xff] %v574_v8 }
 0x51b   :  { %950 = shalt.err (!%p947_p10)
}
 0x51c   :  { %s951_s3 = scalar_lea.hbm %s1203_s10, 128 }
 0x51d   :  { %p952_p11 = scmp.ne.s32.totalorder %s1203_s10, %s951_s3  ;;  %p955_p12 = scmp.lt.u32.totalorder %s951_s3, %s1203_s10 }
 0x51f   :  { %p957_p13 = pnand %p955_p12, %p952_p11 }
 0x521   :  { %960 = shalt.err (!%p957_p13)
}
 0x522   :  { %585 = dma.vmem_to_hbm [thread:$0]  %s583_s5, 128, %s1203_s10, [#allocation4]  }
 0x523   :  { %967 = dma.done.wait [#allocation4], 128  }
 0x524   :  { %968 = vsyncadd [#allocation4], 4294967168 }
 0x525   :  { %969 = dma.done.wait [#allocation13], 128  }
 0x526   :  { %970 = vsyncadd [#allocation13], 4294967168 }
 0x527   :  { %602 = vsyncpa [#allocation3], 1 }
 0x528   :  { %603 = vsyncpa [#allocation6], 1 }
 0x529   :  { %604 = vsyncpa [#allocation9], 1 }
 0x52a   :  { %605 = vsyncpa [#allocation4], 1 }
 0x52b   :  { %606 = vsyncpa [#allocation13], 1 }

</bundles_post_ra>
